<compile_context>
chip_gen: v5e
topology: v5e:2x2
jax: 0.10.0
libtpu: 0.0.40
codegen_flags: <defaults>
</compile_context>

<pallas_src>
import jax
import jax.numpy as jnp
from jax import lax
from jax.experimental import pallas as pl
from jax.experimental.pallas import tpu as pltpu


def _round_up(x, m):
    return (x + m - 1) // m * m


def _gated_fusion_kernel(a_ref, b_ref, w_ref, o_ref):
    a = a_ref[...]                      # (tm, Hp)
    b = b_ref[...]                      # (tm, Hp)
    w = w_ref[...]                      # (Hp, Hp), torch layout (out, in)
    tm = a.shape[0]

    # Single MXU pass over the shared weight: stack a/b along rows so the RHS
    # (weight) is pushed once per grid step; contraction on w's second axis
    # implements y = x @ W.T without materializing a transpose.
    ab = jnp.concatenate([a, b], axis=0)                       # (2*tm, Hp)
    f = lax.dot_general(
        ab, w,
        dimension_numbers=(((1,), (1,)), ((), ())),
        preferred_element_type=jnp.float32)                    # (2*tm, Hp) f32
    fa = f[:tm]
    fb = f[tm:]

    # Elementwise 2-way softmax over the modality axis (numerically stable),
    # f32 epilogue regardless of input dtype.
    m = jnp.maximum(fa, fb)
    ea = jnp.exp(fa - m)
    eb = jnp.exp(fb - m)
    inv = pl.reciprocal(ea + eb, approx=True)                  # EUP slot, ~free
    out = (ea * a.astype(jnp.float32) + eb * b.astype(jnp.float32)) * inv
    o_ref[...] = out.astype(o_ref.dtype)


def multimodal_gated_fusion(a, b, w, *, tm=512, vmem_limit_bytes=None):
    """a, b: [..., hidden]; w: [hidden, hidden] torch Linear weight (out, in), no bias.

    For best MXU throughput on v6e/v7x pass a/b/w in bfloat16; accumulation and the
    softmax-gate epilogue stay in float32 either way.
    """
    orig_shape = a.shape
    H = orig_shape[-1]
    a2 = a.reshape(-1, H)
    b2 = b.reshape(-1, H)
    N = a2.shape[0]

    # Lane-dense hidden dim (multiple of 128) -> unmasked vector stores.
    Hp = _round_up(max(H, 128), 128)
    # Row tile: largest multiple of 128 not exceeding the (padded) row count.
    tm = _round_up(max(tm, 128), 128)
    tm = max(128, min(tm, _round_up(N, 128)))
    Np = _round_up(N, tm)

    if Hp != H:
        a2 = jnp.pad(a2, ((0, 0), (0, Hp - H)))
        b2 = jnp.pad(b2, ((0, 0), (0, Hp - H)))
        w = jnp.pad(w, ((0, Hp - H), (0, Hp - H)))
    if Np != N:
        a2 = jnp.pad(a2, ((0, Np - N), (0, 0)))
        b2 = jnp.pad(b2, ((0, Np - N), (0, 0)))

    if vmem_limit_bytes is None:
        itemsize = jnp.dtype(a2.dtype).itemsize
        io_bytes = 2 * 3 * tm * Hp * itemsize          # double-buffered a, b, out tiles
        w_bytes = 2 * Hp * Hp * jnp.dtype(w.dtype).itemsize  # resident weight block
        tmp_bytes = 8 * tm * Hp * 4                    # f32 intermediates (ab, f, ea, eb, ...)
        vmem_limit_bytes = int(
            min(96 * 1024 * 1024,
                max(32 * 1024 * 1024, io_bytes + w_bytes + tmp_bytes + (4 << 20))))

    grid = (Np // tm,)
    out = pl.pallas_call(
        _gated_fusion_kernel,
        out_shape=jax.ShapeDtypeStruct((Np, Hp), a.dtype),
        grid_spec=pltpu.PrefetchScalarGridSpec(
            num_scalar_prefetch=0,
            grid=grid,
            in_specs=[
                pl.BlockSpec((tm, Hp), lambda i: (i, 0)),
                pl.BlockSpec((tm, Hp), lambda i: (i, 0)),
                # Constant index_map: the weight is DMA'd once per core and
                # kept resident across the (parallel) row grid.
                pl.BlockSpec((Hp, Hp), lambda i: (0, 0)),
            ],
            out_specs=pl.BlockSpec((tm, Hp), lambda i: (i, 0)),
        ),
        compiler_params=pltpu.CompilerParams(
            dimension_semantics=("parallel",),
            vmem_limit_bytes=vmem_limit_bytes,
        ),
    )(a2, b2, w)

    return out[:N, :H].reshape(orig_shape)


def _reference(a, b, w):
    fa = a @ w.T
    fb = b @ w.T
    stacked = jnp.stack([fa, fb], axis=-2)
    sm = jax.nn.softmax(stacked, axis=-2)
    utters = jnp.stack([a, b], axis=-2)
    return jnp.sum(sm * utters, axis=-2)


if __name__ == "__main__":
    batch, seq, hidden = 2, 8, 32
    key = jax.random.PRNGKey(0)
    ka, kb, kw = jax.random.split(key, 3)

    a = jax.random.normal(ka, (batch, seq, hidden), dtype=jnp.float32)
    b = jax.random.normal(kb, (batch, seq, hidden), dtype=jnp.float32)
    # Deterministic Linear weight (out_features, in_features), no bias.
    bound = 1.0 / (hidden ** 0.5)
    w = jax.random.uniform(kw, (hidden, hidden), dtype=jnp.float32,
                           minval=-bound, maxval=bound)

    out = multimodal_gated_fusion(a, b, w)
    jax.block_until_ready(out)

    ref = _reference(a, b, w)
    # Slightly relaxed tolerance: the softmax denominator uses the EUP
    # approximate reciprocal (pl.reciprocal(approx=True)).
    assert out.shape == ref.shape, "shape mismatch vs reference"
    assert jnp.allclose(out, ref, atol=5e-3, rtol=5e-3), "mismatch vs reference"

    print("KERNEL_OK")
</pallas_src>

<mosaic_0001>
module attributes {stable_mosaic.version = 11 : i64} {
  func.func @_gated_fusion_kernel(%arg0: i32, %arg1: memref<128x128xf32, #tpu.memory_space<vmem>>, %arg2: memref<128x128xf32, #tpu.memory_space<vmem>>, %arg3: memref<128x128xf32, #tpu.memory_space<vmem>>, %arg4: memref<128x128xf32, #tpu.memory_space<vmem>>) attributes {dimension_semantics = [#tpu.dimension_semantics<parallel>], iteration_bounds = array<i64: 1>, scalar_prefetch = 0 : i64, scratch_operands = 0 : i64, tpu.core_type = #tpu.core_type<tc>, window_params = [{transform_indices = @transform_0, window_bounds = array<i64: 128, 128>}, {transform_indices = @transform_1, window_bounds = array<i64: 128, 128>}, {pipeline_mode = #tpu.pipeline_mode<synchronous>, transform_indices = @transform_2, window_bounds = array<i64: 128, 128>}, {transform_indices = @transform_3, window_bounds = array<i64: 128, 128>}]} {
    %c0 = arith.constant 0 : index
    %c0_0 = arith.constant 0 : index
    %0 = vector.load %arg1[%c0, %c0_0] : memref<128x128xf32, #tpu.memory_space<vmem>>, vector<128x128xf32>
    %c0_1 = arith.constant 0 : index
    %c0_2 = arith.constant 0 : index
    %1 = vector.load %arg2[%c0_1, %c0_2] : memref<128x128xf32, #tpu.memory_space<vmem>>, vector<128x128xf32>
    %c0_3 = arith.constant 0 : index
    %c0_4 = arith.constant 0 : index
    %2 = vector.load %arg3[%c0_3, %c0_4] : memref<128x128xf32, #tpu.memory_space<vmem>>, vector<128x128xf32>
    %3 = tpu.concatenate %0, %1 in 0 : vector<128x128xf32>, vector<128x128xf32> -> vector<256x128xf32>
    %cst = arith.constant dense<0.000000e+00> : vector<256x128xf32>
    %4 = tpu.matmul %3, %2, %cst {dimension_numbers = #tpu.dot_dimension_numbers<[1], [1], [0], [0], [0, 0, 1, 0], [], []>} : vector<256x128xf32>, vector<128x128xf32>, vector<256x128xf32> -> vector<256x128xf32>
    %5 = vector.extract_strided_slice %4 {offsets = [0, 0], sizes = [128, 128], strides = [1, 1]} : vector<256x128xf32> to vector<128x128xf32>
    %6 = vector.extract_strided_slice %4 {offsets = [128, 0], sizes = [128, 128], strides = [1, 1]} : vector<256x128xf32> to vector<128x128xf32>
    %7 = arith.maximumf %5, %6 : vector<128x128xf32>
    %8 = arith.subf %5, %7 : vector<128x128xf32>
    %9 = math.exp %8 : vector<128x128xf32>
    %10 = arith.subf %6, %7 : vector<128x128xf32>
    %11 = math.exp %10 : vector<128x128xf32>
    %12 = arith.addf %9, %11 : vector<128x128xf32>
    %13 = tpu.reciprocal %12 {approx = true} : vector<128x128xf32> -> vector<128x128xf32>
    %14 = arith.mulf %9, %0 : vector<128x128xf32>
    %15 = arith.mulf %11, %1 : vector<128x128xf32>
    %16 = arith.addf %14, %15 : vector<128x128xf32>
    %17 = arith.mulf %16, %13 : vector<128x128xf32>
    %c0_5 = arith.constant 0 : index
    %c0_6 = arith.constant 0 : index
    %18 = vector.load %arg4[%c0_5, %c0_6] : memref<128x128xf32, #tpu.memory_space<vmem>>, vector<128x128xf32>
    tpu.vector_store %arg4[%c0_5, %c0_6], %17 {strides = array<i32>} : memref<128x128xf32, #tpu.memory_space<vmem>>, vector<128x128xf32>,
    return
  }
  func.func @transform_0(%arg0: i32) -> (i32, i32) {
    %c0_i32 = arith.constant 0 : i32
    %c0_i32_0 = arith.constant 0 : i32
    return %arg0, %c0_i32 : i32, i32
  }
  func.func @transform_1(%arg0: i32) -> (i32, i32) {
    %c0_i32 = arith.constant 0 : i32
    %c0_i32_0 = arith.constant 0 : i32
    return %arg0, %c0_i32 : i32, i32
  }
  func.func @transform_2(%arg0: i32) -> (i32, i32) {
    %c0_i32 = arith.constant 0 : i32
    %c0_i32_0 = arith.constant 0 : i32
    %c0_i32_1 = arith.constant 0 : i32
    return %c0_i32, %c0_i32_0 : i32, i32
  }
  func.func @transform_3(%arg0: i32) -> (i32, i32) {
    %c0_i32 = arith.constant 0 : i32
    %c0_i32_0 = arith.constant 0 : i32
    return %arg0, %c0_i32 : i32, i32
  }
}

</mosaic_0001>

<bundles_post_ra>
// kernel: tpu_custom_call.1
= control target key start
LH: loop header
LB: loop body
LE: loop exit
PB: predicated region body
PF: predicated region fallthrough
CT: control target
= control target key end

     0   :  { %8 = vsyncpa [#allocation3], 0  ;;  %s897_s0 = inlined_call_operand.hbm [shape: f32[128,128], index: 0, kind: input, shape index: {}]   ;;  %s898_s1 = inlined_call_operand.hbm [shape: f32[128,128], index: 1, kind: input, shape index: {}]   ;;  %s899_s2 = inlined_call_operand.hbm [shape: f32[128,128], index: 2, kind: input, shape index: {}]   ;;  %s900_s3 = inlined_call_operand.hbm [shape: f32[128,128], index: 3, kind: output, shape index: {}]  }
   0x1   :  { %9 = vsyncpa [#allocation6], 0 }
   0x2   :  { %10 = vsyncpa [#allocation4], 0  ;;  %s28_s14 = sshll.u32 %s898_s1, 4  ;;  %s719_s15 = smov [#allocation5]   ;;  %s29_s14 = int_to_ptr.hbm [resolvable:$true] %s28_s14 }
   0x3   :  { %s30_s16 = sshll.u32 %s719_s15, 4  ;;  %s15_s19 = sshll.u32 %s897_s0, 4  ;;  %s31_s16 = int_to_ptr.vmem [resolvable:$true] %s30_s16  ;;  %s16_s19 = int_to_ptr.hbm [resolvable:$true] %s15_s19 }
   0x4   :  { %s720_s20 = smov 128   ;;  %s721_s21 = smov 8  }
   0x5   :  { %36 = dma.hbm_to_vmem [thread:$0]  %s29_s14, 2048, %s31_s16, [#allocation6], %s720_s20, %s720_s20, %s721_s21  }
   0x6   :  { %s722_s22 = smov [#allocation2]   ;;  %s41_s1 = sshll.u32 %s899_s2, 4  ;;  %s42_s1 = int_to_ptr.hbm [resolvable:$true] %s41_s1 }
   0x7   :  { %s17_s23 = sshll.u32 %s722_s22, 4  ;;  %s723_s0 = smov [#allocation7]   ;;  %s18_s23 = int_to_ptr.vmem [resolvable:$true] %s17_s23 }
   0x8   :  { %23 = dma.hbm_to_vmem [thread:$0]  %s16_s19, 2048, %s18_s23, [#allocation3], %s720_s20, %s720_s20, %s721_s21  }
   0x9   :  { %s43_s26 = sshll.u32 %s723_s0, 4  ;;  %s44_s26 = int_to_ptr.vmem [resolvable:$true] %s43_s26 }
   0xa   :  { %49 = dma.hbm_to_vmem [thread:$0]  %s42_s1, 2048, %s44_s26, [#allocation6], %s720_s20, %s720_s20, %s721_s21  }
   0xb   :  { %713 = dma.done.wait [#allocation3], 2048  }
   0xc   :  { %714 = vsyncadd [#allocation3], 4294965248 }
   0xd   :  { %715 = dma.done.wait [#allocation6], 4096  }
   0xe   :  { %716 = vsyncadd [#allocation6], 4294963200  ;;  %v109_v0 = vld [vmem:[#allocation7 + $0x78] sm:$0xff]  ;;  %v108_v1 = vld [vmem:[#allocation7 + $0x70] sm:$0xff]  ;;  %s724_s2 = smov [#allocation8]   ;;  %s453_s30 = sshll.u32 %s900_s3, 4  ;;  %s454_s30 = int_to_ptr.hbm [resolvable:$true] %s453_s30 }
   0xf   :  { %468 = vmatpush.xpose.msra.mxu2 %v109_v0  ;;  %469 = vmatpush.xpose.msra.mxu3 %v109_v0  ;;  %v107_v2 = vld [vmem:[#allocation7 + $0x68] sm:$0xff]  ;;  %v106_v3 = vld [vmem:[#allocation7 + $0x60] sm:$0xff]  ;;  %v105_v4 = vld [vmem:[#allocation7 + $0x58] sm:$0xff]  ;;  %s451_s27 = sshll.u32 %s724_s2, 4  ;;  %s452_s27 = int_to_ptr.vmem [resolvable:$true] %s451_s27 }
  0x10   :  { %110 = vmatpush.xpose.msra.mxu0 %v109_v0  ;;  %467 = vmatpush.xpose.msra.mxu1 %v109_v0  ;;  %v104_v5 = vld [vmem:[#allocation7 + $0x50] sm:$0xff]  ;;  %v103_v6 = vld [vmem:[#allocation7 + $0x48] sm:$0xff]  ;;  %v102_v7 = vld [vmem:[#allocation7 + $0x40] sm:$0xff] }
  0x11   :  { %v101_v8 = vld [vmem:[#allocation7 + $0x38] sm:$0xff]  ;;  %v100_v9 = vld [vmem:[#allocation7 + $0x30] sm:$0xff]  ;;  %v99_v10 = vld [vmem:[#allocation7 + $0x28] sm:$0xff] }
  0x12   :  { %v98_v11 = vld [vmem:[#allocation7 + $0x20] sm:$0xff]  ;;  %v97_v12 = vld [vmem:[#allocation7 + $0x18] sm:$0xff]  ;;  %v96_v13 = vld [vmem:[#allocation7 + $0x10] sm:$0xff] }
  0x13   :  { %471 = vmatpush.xpose.msra.mxu2 %v108_v1  ;;  %472 = vmatpush.xpose.msra.mxu3 %v108_v1  ;;  %v95_v14 = vld [vmem:[#allocation7 + $0x8] sm:$0xff]  ;;  %v94_v15 = vld [vmem:[#allocation7] sm:$0xff]  ;;  %v787_v24 = vld [vmem:[#allocation5 + $0x10] sm:$0xff] }
  0x14   :  { %111 = vmatpush.xpose.msra.mxu0 %v108_v1  ;;  %470 = vmatpush.xpose.msra.mxu1 %v108_v1  ;;  %v763_v16 = vld [vmem:[#allocation5] sm:$0xff]  ;;  %v775_v20 = vld [vmem:[#allocation5 + $0x8] sm:$0xff]  ;;  %v789_v25 = vld [vmem:[#allocation5 + $0x50] sm:$0xff] }
  0x15   :  { %v765_v17 = vld [vmem:[#allocation5 + $0x40] sm:$0xff]  ;;  %v777_v21 = vld [vmem:[#allocation5 + $0x48] sm:$0xff]  ;;  %v791_v26 = vld [vmem:[#allocation2 + $0x10] sm:$0xff] }
  0x16   :  { %v767_v18 = vld [vmem:[#allocation2] sm:$0xff]  ;;  %v779_v22 = vld [vmem:[#allocation2 + $0x8] sm:$0xff]  ;;  %v793_v27 = vld [vmem:[#allocation2 + $0x50] sm:$0xff] }
  0x17   :  { %474 = vmatpush.xpose.msra.mxu2 %v107_v2  ;;  %475 = vmatpush.xpose.msra.mxu3 %v107_v2  ;;  %v769_v19 = vld [vmem:[#allocation2 + $0x40] sm:$0xff]  ;;  %v781_v23 = vld [vmem:[#allocation2 + $0x48] sm:$0xff]  ;;  %v799_v28 = vld [vmem:[#allocation5 + $0x18] sm:$0xff] }
  0x18   :  { %112 = vmatpush.xpose.msra.mxu0 %v107_v2  ;;  %473 = vmatpush.xpose.msra.mxu1 %v107_v2  ;;  %v801_v29 = vld [vmem:[#allocation5 + $0x58] sm:$0xff]  ;;  %v811_v32 = vld [vmem:[#allocation5 + $0x20] sm:$0xff]  ;;  %v823_v36 = vld [vmem:[#allocation5 + $0x28] sm:$0xff] }
  0x19   :  { %v803_v30 = vld [vmem:[#allocation2 + $0x18] sm:$0xff]  ;;  %v813_v33 = vld [vmem:[#allocation5 + $0x60] sm:$0xff]  ;;  %v825_v37 = vld [vmem:[#allocation5 + $0x68] sm:$0xff] }
  0x1a   :  { %v805_v31 = vld [vmem:[#allocation2 + $0x58] sm:$0xff]  ;;  %v815_v34 = vld [vmem:[#allocation2 + $0x20] sm:$0xff]  ;;  %v827_v38 = vld [vmem:[#allocation2 + $0x28] sm:$0xff] }
  0x1b   :  { %477 = vmatpush.xpose.msra.mxu2 %v106_v3  ;;  %478 = vmatpush.xpose.msra.mxu3 %v106_v3  ;;  %v817_v35 = vld [vmem:[#allocation2 + $0x60] sm:$0xff]  ;;  %v829_v39 = vld [vmem:[#allocation2 + $0x68] sm:$0xff]  ;;  %v835_v40 = vld [vmem:[#allocation5 + $0x30] sm:$0xff] }
  0x1c   :  { %113 = vmatpush.xpose.msra.mxu0 %v106_v3  ;;  %476 = vmatpush.xpose.msra.mxu1 %v106_v3  ;;  %v837_v41 = vld [vmem:[#allocation5 + $0x70] sm:$0xff]  ;;  %v847_v44 = vld [vmem:[#allocation5 + $0x38] sm:$0xff] }
  0x1d   :  { %v839_v42 = vld [vmem:[#allocation2 + $0x30] sm:$0xff]  ;;  %v849_v45 = vld [vmem:[#allocation5 + $0x78] sm:$0xff] }
  0x1e   :  { %v841_v43 = vld [vmem:[#allocation2 + $0x70] sm:$0xff]  ;;  %v851_v46 = vld [vmem:[#allocation2 + $0x38] sm:$0xff] }
  0x1f   :  { %480 = vmatpush.xpose.msra.mxu2 %v105_v4  ;;  %481 = vmatpush.xpose.msra.mxu3 %v105_v4  ;;  %v853_v47 = vld [vmem:[#allocation2 + $0x78] sm:$0xff] }
  0x20   :  { %114 = vmatpush.xpose.msra.mxu0 %v105_v4  ;;  %479 = vmatpush.xpose.msra.mxu1 %v105_v4 }
  0x23   :  { %483 = vmatpush.xpose.msra.mxu2 %v104_v5  ;;  %484 = vmatpush.xpose.msra.mxu3 %v104_v5 }
  0x24   :  { %115 = vmatpush.xpose.msra.mxu0 %v104_v5  ;;  %482 = vmatpush.xpose.msra.mxu1 %v104_v5 }
  0x27   :  { %486 = vmatpush.xpose.msra.mxu2 %v103_v6  ;;  %487 = vmatpush.xpose.msra.mxu3 %v103_v6 }
  0x28   :  { %116 = vmatpush.xpose.msra.mxu0 %v103_v6  ;;  %485 = vmatpush.xpose.msra.mxu1 %v103_v6 }
  0x2b   :  { %489 = vmatpush.xpose.msra.mxu2 %v102_v7  ;;  %490 = vmatpush.xpose.msra.mxu3 %v102_v7 }
  0x2c   :  { %117 = vmatpush.xpose.msra.mxu0 %v102_v7  ;;  %488 = vmatpush.xpose.msra.mxu1 %v102_v7 }
  0x2f   :  { %492 = vmatpush.xpose.msra.mxu2 %v101_v8  ;;  %493 = vmatpush.xpose.msra.mxu3 %v101_v8 }
  0x30   :  { %118 = vmatpush.xpose.msra.mxu0 %v101_v8  ;;  %491 = vmatpush.xpose.msra.mxu1 %v101_v8 }
  0x33   :  { %495 = vmatpush.xpose.msra.mxu2 %v100_v9  ;;  %496 = vmatpush.xpose.msra.mxu3 %v100_v9 }
  0x34   :  { %119 = vmatpush.xpose.msra.mxu0 %v100_v9  ;;  %494 = vmatpush.xpose.msra.mxu1 %v100_v9 }
  0x37   :  { %498 = vmatpush.xpose.msra.mxu2 %v99_v10  ;;  %499 = vmatpush.xpose.msra.mxu3 %v99_v10 }
  0x38   :  { %120 = vmatpush.xpose.msra.mxu0 %v99_v10  ;;  %497 = vmatpush.xpose.msra.mxu1 %v99_v10 }
  0x3b   :  { %501 = vmatpush.xpose.msra.mxu2 %v98_v11  ;;  %502 = vmatpush.xpose.msra.mxu3 %v98_v11 }
  0x3c   :  { %121 = vmatpush.xpose.msra.mxu0 %v98_v11  ;;  %500 = vmatpush.xpose.msra.mxu1 %v98_v11 }
  0x3f   :  { %504 = vmatpush.xpose.msra.mxu2 %v97_v12  ;;  %505 = vmatpush.xpose.msra.mxu3 %v97_v12 }
  0x40   :  { %122 = vmatpush.xpose.msra.mxu0 %v97_v12  ;;  %503 = vmatpush.xpose.msra.mxu1 %v97_v12 }
  0x43   :  { %507 = vmatpush.xpose.msra.mxu2 %v96_v13  ;;  %508 = vmatpush.xpose.msra.mxu3 %v96_v13 }
  0x44   :  { %123 = vmatpush.xpose.msra.mxu0 %v96_v13  ;;  %506 = vmatpush.xpose.msra.mxu1 %v96_v13 }
  0x47   :  { %510 = vmatpush.xpose.msra.mxu2 %v95_v14  ;;  %511 = vmatpush.xpose.msra.mxu3 %v95_v14 }
  0x48   :  { %124 = vmatpush.xpose.msra.mxu0 %v95_v14  ;;  %509 = vmatpush.xpose.msra.mxu1 %v95_v14 }
  0x4b   :  { %513 = vmatpush.xpose.msra.mxu2 %v94_v15  ;;  %514 = vmatpush.xpose.msra.mxu3 %v94_v15 }
  0x4c   :  { %125 = vmatpush.xpose.msra.mxu0 %v94_v15  ;;  %512 = vmatpush.xpose.msra.mxu1 %v94_v15 }
  0x4e   :  { %174 = vmatmul.f32.vlgmr.msra.gmra.mxu2 %v763_v16  ;;  %198 = vmatmul.f32.vlgmr.msra.gmra.mxu3 %v765_v17 }
  0x4f   :  { %126 = vmatmul.f32.vlgmr.msra.gmra.mxu0 %v767_v18  ;;  %150 = vmatmul.f32.vlgmr.msra.gmra.mxu1 %v769_v19 }
  0x56   :  { %177 = vmatmul.f32.gmra.mxu2 %v775_v20  ;;  %201 = vmatmul.f32.gmra.mxu3 %v777_v21 }
  0x57   :  { %129 = vmatmul.f32.gmra.mxu0 %v779_v22  ;;  %153 = vmatmul.f32.gmra.mxu1 %v781_v23 }
  0x5e   :  { %180 = vmatmul.f32.gmra.mxu2 %v787_v24  ;;  %204 = vmatmul.f32.gmra.mxu3 %v789_v25 }
  0x5f   :  { %132 = vmatmul.f32.gmra.mxu0 %v791_v26  ;;  %156 = vmatmul.f32.gmra.mxu1 %v793_v27 }
  0x66   :  { %183 = vmatmul.f32.gmra.mxu2 %v799_v28  ;;  %207 = vmatmul.f32.gmra.mxu3 %v801_v29 }
  0x67   :  { %135 = vmatmul.f32.gmra.mxu0 %v803_v30  ;;  %159 = vmatmul.f32.gmra.mxu1 %v805_v31 }
  0x6e   :  { %186 = vmatmul.f32.gmra.mxu2 %v811_v32  ;;  %210 = vmatmul.f32.gmra.mxu3 %v813_v33 }
  0x6f   :  { %138 = vmatmul.f32.gmra.mxu0 %v815_v34  ;;  %162 = vmatmul.f32.gmra.mxu1 %v817_v35 }
  0x76   :  { %189 = vmatmul.f32.gmra.mxu2 %v823_v36  ;;  %213 = vmatmul.f32.gmra.mxu3 %v825_v37 }
  0x77   :  { %141 = vmatmul.f32.gmra.mxu0 %v827_v38  ;;  %165 = vmatmul.f32.gmra.mxu1 %v829_v39 }
  0x7e   :  { %192 = vmatmul.f32.gmra.mxu2 %v835_v40  ;;  %216 = vmatmul.f32.gmra.mxu3 %v837_v41 }
  0x7f   :  { %144 = vmatmul.f32.gmra.mxu0 %v839_v42  ;;  %168 = vmatmul.f32.gmra.mxu1 %v841_v43 }
  0x86   :  { %195 = vmatmul.f32.gmra.mxu2 %v847_v44  ;;  %219 = vmatmul.f32.gmra.mxu3 %v849_v45 }
  0x87   :  { %147 = vmatmul.f32.gmra.mxu0 %v851_v46  ;;  %171 = vmatmul.f32.gmra.mxu1 %v853_v47 }
  0xcc   :  { %v127_v48 = vpop.f32.mrf.mxu0  ;;  %v151_v49 = vpop.f32.mrf.mxu1 }
  0xd1   :  { %v175_v50 = vpop.f32.mrf.mxu2  ;;  %v199_v51 = vpop.f32.mrf.mxu3 }
  0xd2   :  { %v223_v52 = vmax.f32 %v127_v48, %v175_v50  ;;  %v231_v53 = vmax.f32 %v151_v49, %v199_v51 }
  0xd4   :  { %v239_v54 = vsub.f32 %v127_v48, %v223_v52  ;;  %v287_v55 = vsub.f32 %v175_v50, %v223_v52  ;;  %v247_v56 = vsub.f32 %v151_v49, %v231_v53  ;;  %v295_v57 = vsub.f32 %v199_v51, %v231_v53  ;;  %v130_v58 = vpop.f32.mrf.mxu0  ;;  %v154_v59 = vpop.f32.mrf.mxu1 }
  0xd6   :  { %v255_v60 = vmul.f32 1.442695, %v239_v54  ;;  %v303_v61 = vmul.f32 1.442695, %v287_v55  ;;  %v271_v62 = vmul.f32 1.442695, %v247_v56 }
  0xd7   :  { %v319_v63 = vmul.f32 1.442695, %v295_v57 }
  0xd8   :  { %521 = vpow2.f32 %v255_v60 }
  0xd9   :  { %523 = vpow2.f32 %v303_v61  ;;  %v178_v0 = vpop.f32.mrf.mxu2  ;;  %v202_v1 = vpop.f32.mrf.mxu3 }
  0xda   :  { %525 = vpow2.f32 %v271_v62  ;;  %v224_v2 = vmax.f32 %v130_v58, %v178_v0  ;;  %v232_v3 = vmax.f32 %v154_v59, %v202_v1 }
  0xdb   :  { %527 = vpow2.f32 %v319_v63 }
  0xdc   :  { %v240_v4 = vsub.f32 %v130_v58, %v224_v2  ;;  %v288_v5 = vsub.f32 %v178_v0, %v224_v2  ;;  %v248_v6 = vsub.f32 %v154_v59, %v232_v3  ;;  %v133_v7 = vpop.f32.mrf.mxu0  ;;  %v157_v8 = vpop.f32.mrf.mxu1  ;;  %v296_v9 = vsub.f32 %v202_v1, %v232_v3 }
  0xde   :  { %v522_v10 = vpop.eup %521  ;;  %v257_v11 = vmul.f32 1.442695, %v240_v4  ;;  %v305_v12 = vmul.f32 1.442695, %v288_v5  ;;  %v273_v14 = vmul.f32 1.442695, %v248_v6 }
  0xdf   :  { %v524_v13 = vpop.eup %523  ;;  %v321_v50 = vmul.f32 1.442695, %v296_v9  ;;  %v367_v53 = vmul.f32 %v522_v10, %v767_v18 }
  0xe0   :  { %v526_v15 = vpop.eup %525  ;;  %v335_v48 = vadd.f32 %v524_v13, %v522_v10  ;;  %529 = vpow2.f32 %v257_v11  ;;  %v383_v55 = vmul.f32 %v524_v13, %v763_v16 }
  0xe1   :  { %v528_v49 = vpop.eup %527  ;;  %531 = vpow2.f32 %v305_v12  ;;  %v181_v51 = vpop.f32.mrf.mxu2  ;;  %v375_v58 = vmul.f32 %v526_v15, %v769_v19 }
  0xe2   :  { %v205_v52 = vpop.f32.mrf.mxu3  ;;  %533 = vrcp.f32 %v335_v48  ;;  %v343_v54 = vadd.f32 %v528_v49, %v526_v15  ;;  %v225_v56 = vmax.f32 %v133_v7, %v181_v51  ;;  %v391_v59 = vmul.f32 %v528_v49, %v765_v17 }
  0xe3   :  { %535 = vpow2.f32 %v273_v14  ;;  %v233_v57 = vmax.f32 %v157_v8, %v205_v52  ;;  %v399_v3 = vadd.f32 %v383_v55, %v367_v53 }
  0xe4   :  { %537 = vrcp.f32 %v343_v54  ;;  %v136_v60 = vpop.f32.mrf.mxu0  ;;  %v160_v61 = vpop.f32.mrf.mxu1  ;;  %v241_v62 = vsub.f32 %v133_v7, %v225_v56  ;;  %v289_v63 = vsub.f32 %v181_v51, %v225_v56  ;;  %v407_v19 = vadd.f32 %v391_v59, %v375_v58 }
  0xe5   :  { %539 = vpow2.f32 %v321_v50  ;;  %v249_v0 = vsub.f32 %v157_v8, %v233_v57  ;;  %v297_v2 = vsub.f32 %v205_v52, %v233_v57 }
  0xe6   :  { %v530_v1 = vpop.eup %529  ;;  %v259_v4 = vmul.f32 1.442695, %v241_v62  ;;  %v307_v16 = vmul.f32 1.442695, %v289_v63 }
  0xe7   :  { %v532_v18 = vpop.eup %531  ;;  %v275_v9 = vmul.f32 1.442695, %v249_v0  ;;  %v323_v17 = vmul.f32 1.442695, %v297_v2  ;;  %v368_v7 = vmul.f32 %v530_v1, %v779_v22 }
  0xe8   :  { %v534_v5 = vpop.eup %533  ;;  %v336_v6 = vadd.f32 %v532_v18, %v530_v1  ;;  %541 = vpow2.f32 %v259_v4  ;;  %v384_v49 = vmul.f32 %v532_v18, %v775_v20 }
  0xe9   :  { %v536_v10 = vpop.eup %535  ;;  %v415_v11 = vmul.f32 %v534_v5, %v399_v3  ;;  %v184_v12 = vpop.f32.mrf.mxu2 }
  0xea   :  { %v208_v13 = vpop.f32.mrf.mxu3  ;;  %v538_v14 = vpop.eup %537  ;;  %543 = vrcp.f32 %v336_v6  ;;  %v226_v8 = vmax.f32 %v136_v60, %v184_v12  ;;  %v376_v22 = vmul.f32 %v536_v10, %v781_v23  ;;  %v400_v20 = vadd.f32 %v384_v49, %v368_v7 }
  0xeb   :  { %v540_v15 = vpop.eup %539  ;;  %431 = vst [vmem:[#allocation8] sm:$0xff] %v415_v11  ;;  %v423_v48 = vmul.f32 %v538_v14, %v407_v19  ;;  %545 = vpow2.f32 %v307_v16  ;;  %v234_v50 = vmax.f32 %v160_v61, %v208_v13 }
  0xec   :  { %v344_v51 = vadd.f32 %v540_v15, %v536_v10  ;;  %547 = vpow2.f32 %v275_v9  ;;  %v242_v52 = vsub.f32 %v136_v60, %v226_v8  ;;  %v139_v53 = vpop.f32.mrf.mxu0  ;;  %v163_v54 = vpop.f32.mrf.mxu1  ;;  %v290_v55 = vsub.f32 %v184_v12, %v226_v8 }
  0xed   :  { %439 = vst [vmem:[#allocation8 + $0x40] sm:$0xff] %v423_v48  ;;  %549 = vpow2.f32 %v323_v17  ;;  %v250_v56 = vsub.f32 %v160_v61, %v234_v50  ;;  %v298_v57 = vsub.f32 %v208_v13, %v234_v50  ;;  %v392_v58 = vmul.f32 %v540_v15, %v777_v21 }
  0xee   :  { %551 = vrcp.f32 %v344_v51  ;;  %v261_v59 = vmul.f32 1.442695, %v242_v52  ;;  %v542_v62 = vpop.eup %541  ;;  %v309_v63 = vmul.f32 1.442695, %v290_v55 }
  0xef   :  { %v277_v0 = vmul.f32 1.442695, %v250_v56  ;;  %v325_v1 = vmul.f32 1.442695, %v298_v57  ;;  %v408_v16 = vadd.f32 %v392_v58, %v376_v22  ;;  %v369_v21 = vmul.f32 %v542_v62, %v791_v26 }
  0xf0   :  { %v544_v2 = vpop.eup %543  ;;  %553 = vpow2.f32 %v261_v59 }
  0xf1   :  { %v546_v60 = vpop.eup %545  ;;  %v416_v18 = vmul.f32 %v544_v2, %v400_v20  ;;  %555 = vpow2.f32 %v309_v63  ;;  %v187_v3 = vpop.f32.mrf.mxu2 }
  0xf2   :  { %v211_v4 = vpop.f32.mrf.mxu3  ;;  %v548_v61 = vpop.eup %547  ;;  %v337_v5 = vadd.f32 %v546_v60, %v542_v62  ;;  %557 = vpow2.f32 %v277_v0  ;;  %v227_v23 = vmax.f32 %v139_v53, %v187_v3  ;;  %v385_v9 = vmul.f32 %v546_v60, %v787_v24 }
  0xf3   :  { %v550_v6 = vpop.eup %549  ;;  %432 = vst [vmem:[#allocation8 + $0x8] sm:$0xff] %v416_v18  ;;  %559 = vpow2.f32 %v325_v1  ;;  %v235_v10 = vmax.f32 %v163_v54, %v211_v4  ;;  %v377_v17 = vmul.f32 %v548_v61, %v793_v27 }
  0xf4   :  { %v552_v11 = vpop.eup %551  ;;  %561 = vrcp.f32 %v337_v5  ;;  %v345_v19 = vadd.f32 %v550_v6, %v548_v61  ;;  %v393_v12 = vmul.f32 %v550_v6, %v789_v25  ;;  %v142_v13 = vpop.f32.mrf.mxu0  ;;  %v243_v8 = vsub.f32 %v139_v53, %v227_v23 }
  0xf5   :  { %v166_v14 = vpop.f32.mrf.mxu1  ;;  %v424_v7 = vmul.f32 %v552_v11, %v408_v16  ;;  %v291_v15 = vsub.f32 %v187_v3, %v227_v23  ;;  %v251_v48 = vsub.f32 %v163_v54, %v235_v10  ;;  %v299_v26 = vsub.f32 %v211_v4, %v235_v10 }
  0xf6   :  { %v554_v49 = vpop.eup %553  ;;  %563 = vrcp.f32 %v345_v19  ;;  %v263_v24 = vmul.f32 1.442695, %v243_v8  ;;  %v401_v55 = vadd.f32 %v385_v9, %v369_v21  ;;  %v409_v27 = vadd.f32 %v393_v12, %v377_v17 }
  0xf7   :  { %v556_v50 = vpop.eup %555  ;;  %440 = vst [vmem:[#allocation8 + $0x48] sm:$0xff] %v424_v7  ;;  %v311_v51 = vmul.f32 1.442695, %v291_v15  ;;  %v370_v25 = vmul.f32 %v554_v49, %v803_v30  ;;  %v279_v22 = vmul.f32 1.442695, %v251_v48 }
  0xf8   :  { %v558_v52 = vpop.eup %557  ;;  %v338_v56 = vadd.f32 %v556_v50, %v554_v49  ;;  %565 = vpow2.f32 %v263_v24  ;;  %v386_v54 = vmul.f32 %v556_v50, %v799_v28  ;;  %v327_v20 = vmul.f32 1.442695, %v299_v26 }
  0xf9   :  { %v560_v57 = vpop.eup %559  ;;  %v190_v58 = vpop.f32.mrf.mxu2  ;;  %v378_v60 = vmul.f32 %v558_v52, %v805_v31 }
  0xfa   :  { %v214_v53 = vpop.f32.mrf.mxu3  ;;  %v562_v59 = vpop.eup %561  ;;  %567 = vrcp.f32 %v338_v56  ;;  %v346_v62 = vadd.f32 %v560_v57, %v558_v52  ;;  %v228_v0 = vmax.f32 %v142_v13, %v190_v58  ;;  %v394_v30 = vmul.f32 %v560_v57, %v801_v29 }
  0xfb   :  { %v417_v63 = vmul.f32 %v562_v59, %v401_v55  ;;  %569 = vpow2.f32 %v311_v51  ;;  %v236_v1 = vmax.f32 %v166_v14, %v214_v53  ;;  %v402_v6 = vadd.f32 %v386_v54, %v370_v25 }
  0xfc   :  { %v564_v2 = vpop.eup %563  ;;  %571 = vrcp.f32 %v346_v62  ;;  %v244_v3 = vsub.f32 %v142_v13, %v228_v0  ;;  %v292_v4 = vsub.f32 %v190_v58, %v228_v0  ;;  %v145_v61 = vpop.f32.mrf.mxu0  ;;  %v410_v29 = vadd.f32 %v394_v30, %v378_v60 }
  0xfd   :  { %433 = vst [vmem:[#allocation8 + $0x10] sm:$0xff] %v417_v63  ;;  %v425_v18 = vmul.f32 %v564_v2, %v409_v27  ;;  %573 = vpow2.f32 %v279_v22  ;;  %v169_v16 = vpop.f32.mrf.mxu1  ;;  %v252_v28 = vsub.f32 %v166_v14, %v236_v1  ;;  %v300_v5 = vsub.f32 %v214_v53, %v236_v1 }
  0xfe   :  { %575 = vpow2.f32 %v327_v20  ;;  %v566_v23 = vpop.eup %565  ;;  %v265_v21 = vmul.f32 1.442695, %v244_v3  ;;  %v313_v9 = vmul.f32 1.442695, %v292_v4 }
  0xff   :  { %441 = vst [vmem:[#allocation8 + $0x50] sm:$0xff] %v425_v18  ;;  %v281_v11 = vmul.f32 1.442695, %v252_v28  ;;  %v329_v17 = vmul.f32 1.442695, %v300_v5  ;;  %v371_v50 = vmul.f32 %v566_v23, %v815_v34 }
 0x100   :  { %v568_v10 = vpop.eup %567  ;;  %577 = vpow2.f32 %v265_v21 }
 0x101   :  { %v570_v31 = vpop.eup %569  ;;  %v418_v19 = vmul.f32 %v568_v10, %v402_v6  ;;  %v193_v12 = vpop.f32.mrf.mxu2  ;;  %579 = vpow2.f32 %v313_v9 }
 0x102   :  { %v217_v13 = vpop.f32.mrf.mxu3  ;;  %v572_v7 = vpop.eup %571  ;;  %v339_v8 = vadd.f32 %v570_v31, %v566_v23  ;;  %v229_v15 = vmax.f32 %v145_v61, %v193_v12  ;;  %581 = vpow2.f32 %v281_v11  ;;  %v387_v51 = vmul.f32 %v570_v31, %v811_v32 }
 0x103   :  { %v574_v14 = vpop.eup %573  ;;  %434 = vst [vmem:[#allocation8 + $0x18] sm:$0xff] %v418_v19  ;;  %v426_v48 = vmul.f32 %v572_v7, %v410_v29  ;;  %v237_v49 = vmax.f32 %v169_v16, %v217_v13 }
 0x104   :  { %v576_v26 = vpop.eup %575  ;;  %583 = vrcp.f32 %v339_v8  ;;  %v245_v24 = vsub.f32 %v145_v61, %v229_v15  ;;  %v293_v55 = vsub.f32 %v193_v12, %v229_v15  ;;  %v379_v22 = vmul.f32 %v574_v14, %v817_v35  ;;  %v148_v59 = vpop.f32.mrf.mxu0 }
 0x105   :  { %442 = vst [vmem:[#allocation8 + $0x58] sm:$0xff] %v426_v48  ;;  %v347_v52 = vadd.f32 %v576_v26, %v574_v14  ;;  %585 = vpow2.f32 %v329_v17  ;;  %v253_v57 = vsub.f32 %v169_v16, %v237_v49  ;;  %v301_v27 = vsub.f32 %v217_v13, %v237_v49  ;;  %v172_v54 = vpop.f32.mrf.mxu1 }
 0x106   :  { %v267_v56 = vmul.f32 1.442695, %v245_v24  ;;  %v578_v25 = vpop.eup %577  ;;  %v395_v58 = vmul.f32 %v576_v26, %v813_v33  ;;  %v315_v53 = vmul.f32 1.442695, %v293_v55  ;;  %v403_v63 = vadd.f32 %v387_v51, %v371_v50 }
 0x107   :  { %587 = vrcp.f32 %v347_v52  ;;  %v580_v34 = vpop.eup %579  ;;  %v283_v62 = vmul.f32 1.442695, %v253_v57  ;;  %v331_v20 = vmul.f32 1.442695, %v301_v27  ;;  %v372_v4 = vmul.f32 %v578_v25, %v827_v38 }
 0x108   :  { %589 = vpow2.f32 %v267_v56  ;;  %v582_v32 = vpop.eup %581  ;;  %v340_v0 = vadd.f32 %v580_v34, %v578_v25  ;;  %v411_v33 = vadd.f32 %v395_v58, %v379_v22  ;;  %v388_v61 = vmul.f32 %v580_v34, %v823_v36 }
 0x109   :  { %591 = vpow2.f32 %v315_v53  ;;  %v196_v1 = vpop.f32.mrf.mxu2  ;;  %v380_v23 = vmul.f32 %v582_v32, %v829_v39 }
 0x10a   :  { %v220_v2 = vpop.f32.mrf.mxu3  ;;  %v584_v60 = vpop.eup %583  ;;  %593 = vpow2.f32 %v283_v62  ;;  %v230_v30 = vmax.f32 %v148_v59, %v196_v1  ;;  %v404_v12 = vadd.f32 %v388_v61, %v372_v4 }
 0x10b   :  { %v238_v18 = vmax.f32 %v172_v54, %v220_v2  ;;  %v586_v35 = vpop.eup %585  ;;  %v419_v3 = vmul.f32 %v584_v60, %v403_v63  ;;  %595 = vrcp.f32 %v340_v0 }
 0x10c   :  { %v348_v16 = vadd.f32 %v586_v35, %v582_v32  ;;  %597 = vpow2.f32 %v331_v20  ;;  %v246_v28 = vsub.f32 %v148_v59, %v230_v30  ;;  %v294_v6 = vsub.f32 %v196_v1, %v230_v30 }
 0x10d   :  { %v588_v5 = vpop.eup %587  ;;  %435 = vst [vmem:[#allocation8 + $0x20] sm:$0xff] %v419_v3  ;;  %v254_v21 = vsub.f32 %v172_v54, %v238_v18  ;;  %v302_v9 = vsub.f32 %v220_v2, %v238_v18  ;;  %v396_v31 = vmul.f32 %v586_v35, %v825_v37 }
 0x10e   :  { %v590_v10 = vpop.eup %589  ;;  %v427_v11 = vmul.f32 %v588_v5, %v411_v33  ;;  %599 = vrcp.f32 %v348_v16  ;;  %v269_v19 = vmul.f32 1.442695, %v246_v28  ;;  %v317_v38 = vmul.f32 1.442695, %v294_v6 }
 0x10f   :  { %v592_v29 = vpop.eup %591  ;;  %v285_v17 = vmul.f32 1.442695, %v254_v21  ;;  %v333_v7 = vmul.f32 1.442695, %v302_v9  ;;  %v412_v14 = vadd.f32 %v396_v31, %v380_v23  ;;  %v373_v48 = vmul.f32 %v590_v10, %v839_v42 }
 0x110   :  { %v594_v36 = vpop.eup %593  ;;  %443 = vst [vmem:[#allocation8 + $0x60] sm:$0xff] %v427_v11  ;;  %v341_v13 = vadd.f32 %v592_v29, %v590_v10  ;;  %601 = vpow2.f32 %v269_v19  ;;  %v389_v37 = vmul.f32 %v592_v29, %v835_v40 }
 0x111   :  { %v596_v8 = vpop.eup %595  ;;  %603 = vpow2.f32 %v317_v38  ;;  %v381_v51 = vmul.f32 %v594_v36, %v841_v43 }
 0x112   :  { %v598_v39 = vpop.eup %597  ;;  %v420_v15 = vmul.f32 %v596_v8, %v404_v12  ;;  %605 = vrcp.f32 %v341_v13  ;;  %v405_v56 = vadd.f32 %v389_v37, %v373_v48 }
 0x113   :  { %v349_v49 = vadd.f32 %v598_v39, %v594_v36  ;;  %607 = vpow2.f32 %v285_v17  ;;  %v397_v52 = vmul.f32 %v598_v39, %v837_v41 }
 0x114   :  { %v600_v26 = vpop.eup %599  ;;  %436 = vst [vmem:[#allocation8 + $0x28] sm:$0xff] %v420_v15  ;;  %609 = vpow2.f32 %v333_v7 }
 0x115   :  { %v428_v50 = vmul.f32 %v600_v26, %v412_v14  ;;  %611 = vrcp.f32 %v349_v49  ;;  %v413_v22 = vadd.f32 %v397_v52, %v381_v51 }
 0x116   :  { %v602_v24 = vpop.eup %601 }
 0x117   :  { %v604_v55 = vpop.eup %603  ;;  %444 = vst [vmem:[#allocation8 + $0x68] sm:$0xff] %v428_v50  ;;  %v374_v53 = vmul.f32 %v602_v24, %v851_v46 }
 0x118   :  { %v606_v57 = vpop.eup %605  ;;  %v342_v27 = vadd.f32 %v604_v55, %v602_v24  ;;  %v390_v59 = vmul.f32 %v604_v55, %v847_v44 }
 0x119   :  { %v608_v42 = vpop.eup %607  ;;  %v421_v25 = vmul.f32 %v606_v57, %v405_v56 }
 0x11a   :  { %v610_v40 = vpop.eup %609  ;;  %613 = vrcp.f32 %v342_v27  ;;  %v382_v41 = vmul.f32 %v608_v42, %v853_v47  ;;  %v406_v62 = vadd.f32 %v390_v59, %v374_v53 }
 0x11b   :  { %v612_v58 = vpop.eup %611  ;;  %437 = vst [vmem:[#allocation8 + $0x30] sm:$0xff] %v421_v25  ;;  %v350_v54 = vadd.f32 %v610_v40, %v608_v42  ;;  %v398_v34 = vmul.f32 %v610_v40, %v849_v45 }
 0x11c   :  { %v429_v43 = vmul.f32 %v612_v58, %v413_v22 }
 0x11d   :  { %615 = vrcp.f32 %v350_v54  ;;  %v414_v46 = vadd.f32 %v398_v34, %v382_v41 }
 0x11e   :  { %445 = vst [vmem:[#allocation8 + $0x70] sm:$0xff] %v429_v43 }
 0x120   :  { %v614_v20 = vpop.eup %613 }
 0x121   :  { %v422_v32 = vmul.f32 %v614_v20, %v406_v62 }
 0x123   :  { %v616_v63 = vpop.eup %615  ;;  %438 = vst [vmem:[#allocation8 + $0x38] sm:$0xff] %v422_v32 }
 0x124   :  { %v430_v44 = vmul.f32 %v616_v63, %v414_v46 }
 0x126   :  { %446 = vst [vmem:[#allocation8 + $0x78] sm:$0xff] %v430_v44 }
 0x127   :  { %459 = dma.vmem_to_hbm [thread:$0]  %s452_s27, 2048, %s454_s30, [#allocation4], %s720_s20, %s720_s20, %s721_s21  }
 0x128   :  { %717 = dma.done.wait [#allocation4], 2048  }
 0x129   :  { %718 = vsyncadd [#allocation4], 4294965248 }
 0x12a   :  { %464 = vsyncpa [#allocation3], 1 }
 0x12b   :  { %465 = vsyncpa [#allocation6], 1 }
 0x12c   :  { %466 = vsyncpa [#allocation4], 1 }

</bundles_post_ra>
